<compile_context>
chip_gen: v7x
topology: tpu7x:2x2x1
jax: 0.10.0
libtpu: 0.0.40
codegen_flags: <defaults>
</compile_context>

<pallas_src>
from functools import partial

import jax
import jax.numpy as jnp
from jax.experimental import pallas as pl
from jax.experimental.pallas import tpu as pltpu

_TILE_ROWS = 8     # sublane tile
_LANES = 128       # lane width (lane-dense output)


def _policy_kernel(logits_ref, state_ref, out_ref):
    # logits_ref: SMEM (2,) f32 (scalar-prefetched); state_ref: VMEM (8, 1) i32
    l0 = logits_ref[0]
    l1 = logits_ref[1]

    st = state_ref[...]                                   # (8, 1) int32
    # Safe "gather": logits has exactly 2 entries -> select, never OOB.
    logit = jnp.where(st == 0, l0, l1)                    # (8, 1) f32

    lane = jax.lax.broadcasted_iota(jnp.int32, out_ref.shape, 1)   # (8, 128)
    # lane 0 -> sigmoid(-logit) == 1 - p ; lane 1 -> sigmoid(+logit) == p
    signed = jnp.where(lane == 0, -logit, logit)          # broadcast to (8, 128)
    p_all = pl.reciprocal(1.0 + jnp.exp(-signed), approx=True)     # EUP exp + EUP recip
    out_ref[...] = jnp.where(lane < 2, p_all, 0.0)


@jax.jit
def simple_policy_forward_batch(logits, states):
    """Batched Pallas equivalent of SimplePolicy.forward.

    Args:
      logits: (2,) float32 parameter vector.
      states: (B,) int array of states in {0, 1}.
    Returns:
      (B, 2) float32: row i = [1 - sigmoid(logits[states[i]]), sigmoid(logits[states[i]])]
    """
    logits = jnp.asarray(logits, dtype=jnp.float32).reshape((2,))
    states = jnp.asarray(states, dtype=jnp.int32).reshape((-1,))
    b = states.shape[0]
    b_pad = ((b + _TILE_ROWS - 1) // _TILE_ROWS) * _TILE_ROWS

    # Pad to a multiple of the sublane tile and lay out as a (b_pad, 1) column.
    states_col = jnp.zeros((b_pad, 1), dtype=jnp.int32).at[:b, 0].set(states)

    grid_spec = pltpu.PrefetchScalarGridSpec(
        num_scalar_prefetch=1,                       # logits -> SMEM
        grid=(b_pad // _TILE_ROWS,),
        in_specs=[pl.BlockSpec((_TILE_ROWS, 1), lambda i, logits_ref: (i, 0))],
        out_specs=pl.BlockSpec((_TILE_ROWS, _LANES), lambda i, logits_ref: (i, 0)),
    )

    out_padded = pl.pallas_call(
        _policy_kernel,
        out_shape=jax.ShapeDtypeStruct((b_pad, _LANES), jnp.float32),
        grid_spec=grid_spec,
        compiler_params=pltpu.CompilerParams(
            dimension_semantics=("parallel",)),      # shard rows across TCs on v7x
    )(logits, states_col)

    return out_padded[:b, :2]


@jax.jit
def simple_policy_forward(logits, state):
    """Scalar (module-style) forward: returns (2,) probs for a single state."""
    state_vec = jnp.asarray(state, dtype=jnp.int32).reshape((1,))
    return simple_policy_forward_batch(logits, state_vec)[0]


def _reference_forward(logits, state):
    p = jax.nn.sigmoid(logits[state])
    return jnp.stack([1.0 - p, p])


def _reference_batch(logits, states):
    p = jax.nn.sigmoid(logits[states])
    return jnp.stack([1.0 - p, p], axis=-1)


if __name__ == "__main__":
    key = jax.random.PRNGKey(0)
    k_states, k_logits = jax.random.split(key)

    # Parameter init matches the module's __init__: logits = zeros(2),
    # plus a random vector to exercise the select + sigmoid path.
    logits_zero = jnp.zeros((2,), dtype=jnp.float32)
    logits_rand = jax.random.normal(k_logits, (2,), dtype=jnp.float32)

    # Small batch of states in {0, 1}.
    states = jax.random.randint(k_states, (8,), 0, 2, dtype=jnp.int32)

    # approx=True reciprocal -> loosen tolerance slightly vs exact sigmoid.
    TOL = 2e-3

    ok = True
    for lg in (logits_zero, logits_rand):
        # Batched path.
        probs_b = jax.block_until_ready(simple_policy_forward_batch(lg, states))
        ref_b = _reference_batch(lg, states)
        if probs_b.shape != (8, 2) or probs_b.dtype != jnp.float32:
            ok = False
        if not jnp.allclose(probs_b, ref_b, atol=TOL, rtol=TOL):
            ok = False

        # Scalar (original-module) path.
        for s in (0, 1):
            probs = jax.block_until_ready(simple_policy_forward(lg, s))
            ref = _reference_forward(lg, s)
            if probs.shape != (2,) or probs.dtype != jnp.float32:
                ok = False
            if not jnp.allclose(probs, ref, atol=TOL, rtol=TOL):
                ok = False

    print("KERNEL_OK" if ok else "KERNEL_MISMATCH")
</pallas_src>

<mosaic_0001>
module attributes {stable_mosaic.version = 11 : i64} {
  func.func @_policy_kernel(%arg0: i32, %arg1: memref<2xf32, #tpu.memory_space<smem>>, %arg2: memref<8x1xi32, #tpu.memory_space<vmem>>, %arg3: memref<8x128xf32, #tpu.memory_space<vmem>>) attributes {dimension_semantics = [#tpu.dimension_semantics<parallel>], iteration_bounds = array<i64: 1>, scalar_prefetch = 1 : i64, scratch_operands = 0 : i64, tpu.core_type = #tpu.core_type<tc>, window_params = [{transform_indices = @transform_0, window_bounds = array<i64: 8, 1>}, {transform_indices = @transform_1, window_bounds = array<i64: 8, 128>}]} {
    %c0 = arith.constant 0 : index
    %0 = memref.load %arg1[%c0] : memref<2xf32, #tpu.memory_space<smem>>
    %c1 = arith.constant 1 : index
    %1 = memref.load %arg1[%c1] : memref<2xf32, #tpu.memory_space<smem>>
    %c0_0 = arith.constant 0 : index
    %c0_1 = arith.constant 0 : index
    %2 = vector.load %arg2[%c0_0, %c0_1] : memref<8x1xi32, #tpu.memory_space<vmem>>, vector<8x1xi32>
    %c0_i32 = arith.constant 0 : i32
    %3 = vector.broadcast %c0_i32 : i32 to vector<8x1xi32>
    %4 = arith.cmpi eq, %2, %3 : vector<8x1xi32>
    %5 = vector.broadcast %0 : f32 to vector<8x1xf32>
    %6 = vector.broadcast %1 : f32 to vector<8x1xf32>
    %7 = arith.select %4, %5, %6 : vector<8x1xi1>, vector<8x1xf32>
    %8 = tpu.iota {dimensions = array<i32: 1>} : vector<8x128xi32>
    %c0_i32_2 = arith.constant 0 : i32
    %9 = vector.broadcast %c0_i32_2 : i32 to vector<8x128xi32>
    %10 = arith.cmpi eq, %8, %9 : vector<8x128xi32>
    %cst = arith.constant 0.000000e+00 : f32
    %11 = vector.broadcast %cst : f32 to vector<8x1xf32>
    %12 = arith.subf %11, %7 : vector<8x1xf32>
    %13 = vector.shape_cast %12 : vector<8x1xf32> to vector<8x1xf32>
    %14 = vector.broadcast %13 : vector<8x1xf32> to vector<8x128xf32>
    %15 = vector.shape_cast %7 : vector<8x1xf32> to vector<8x1xf32>
    %16 = vector.broadcast %15 : vector<8x1xf32> to vector<8x128xf32>
    %17 = arith.select %10, %14, %16 : vector<8x128xi1>, vector<8x128xf32>
    %cst_3 = arith.constant 0.000000e+00 : f32
    %18 = vector.broadcast %cst_3 : f32 to vector<8x128xf32>
    %19 = arith.subf %18, %17 : vector<8x128xf32>
    %20 = math.exp %19 : vector<8x128xf32>
    %cst_4 = arith.constant 1.000000e+00 : f32
    %21 = vector.broadcast %cst_4 : f32 to vector<8x128xf32>
    %22 = arith.addf %21, %20 : vector<8x128xf32>
    %23 = tpu.reciprocal %22 {approx = true} : vector<8x128xf32> -> vector<8x128xf32>
    %c2_i32 = arith.constant 2 : i32
    %24 = vector.broadcast %c2_i32 : i32 to vector<8x128xi32>
    %25 = arith.cmpi slt, %8, %24 : vector<8x128xi32>
    %cst_5 = arith.constant 0.000000e+00 : f32
    %26 = vector.broadcast %cst_5 : f32 to vector<8x128xf32>
    %27 = arith.select %25, %23, %26 : vector<8x128xi1>, vector<8x128xf32>
    %c0_6 = arith.constant 0 : index
    %c0_7 = arith.constant 0 : index
    %28 = vector.load %arg3[%c0_6, %c0_7] : memref<8x128xf32, #tpu.memory_space<vmem>>, vector<8x128xf32>
    tpu.vector_store %arg3[%c0_6, %c0_7], %27 {strides = array<i32>} : memref<8x128xf32, #tpu.memory_space<vmem>>, vector<8x128xf32>,
    return
  }
  func.func @transform_0(%arg0: i32, %arg1: memref<2xf32, #tpu.memory_space<smem>>) -> (i32, i32) {
    %c0_i32 = arith.constant 0 : i32
    %c0_i32_0 = arith.constant 0 : i32
    return %arg0, %c0_i32 : i32, i32
  }
  func.func @transform_1(%arg0: i32, %arg1: memref<2xf32, #tpu.memory_space<smem>>) -> (i32, i32) {
    %c0_i32 = arith.constant 0 : i32
    %c0_i32_0 = arith.constant 0 : i32
    return %arg0, %c0_i32 : i32, i32
  }
}

</mosaic_0001>

<bundles_post_ra>
// kernel: simple_policy_forward_batch.1
= control target key start
LH: loop header
LB: loop body
LE: loop exit
PB: predicated region body
PF: predicated region fallthrough
CT: control target
= control target key end

     0   :  { %s97_s0 = inlined_call_operand.vmem [shape: f32[2], index: 0, kind: input, shape index: {}]   ;;  %s98_s1 = inlined_call_operand.vmem [shape: s32[8,1], index: 1, kind: input, shape index: {}]   ;;  %s99_s2 = inlined_call_operand.vmem [shape: f32[8,128], index: 2, kind: output, shape index: {}]  }
   0x1   :  { %s7_s11 = sshll.u32 %s97_s0, 4  ;;  %s8_s11 = int_to_ptr.vmem [resolvable:$true] %s7_s11 }
   0x2   :  { %s57_s12 = scalar_lea.vmem %s8_s11, 16  ;;  %p62_p1 = scmp.lt.s32.totalorder %s8_s11, %s8_s11 }
   0x3   :  { %p58_p0 = scmp.ne.s32.totalorder %s8_s11, %s57_s12  ;;  %p63_p2 = scmp.lt.s32.totalorder %s57_s12, %s57_s12 }
   0x5   :  { %p64_p3 = por %p63_p2, %p62_p1 }
   0x7   :  { %p65_p4 = pnand %p64_p3, %p58_p0 }
   0x9   :  { %68 = shalt.err (!%p65_p4)  }
   0xa   :  { %s71_s13 = smov [#allocation3]  }
   0xb   :  { %10 = dma.vmem_to_smem %s8_s11, 16, %s71_s13, [#allocation2] }
   0xc   :  { %69 = dma.done.wait [#allocation2], 16 }
   0xd   :  { %70 = vsyncadd [#allocation2], 4294967280 }
   0xe   :  { %12 = sfence }
   0xf   :  { %s15_s14 = sld [smem:[#allocation3]]  ;;  %s49_s15 = sld [smem:[#allocation3 + $0x1]]  ;;  %v72_v0 = vmov 0   ;;  %v17_v1 = vld [vmem:[%s98_s1] sm:$0xff]  ;;  %v22_v6 = vlaneseq }
  0x10   :  { %52 = vset.pattern.permute.xlu0 %v72_v0  ;;  %vm18_vm0 = vcmp.eq.s32.totalorder %v17_v1, 0 }
  0x11   :  { %v23_v7 = vand.u32 127, %v22_v6 }
  0x13   :  { %vm24_vm1 = vcmp.eq.s32.totalorder %v23_v7, 0  ;;  %vm42_vm2 = vcmp.lt.s32.totalorder %v23_v7, 2 }
  0x15   :  { %v19_v2 = vstv %s15_s14  ;;  %v20_v3 = vstv %s49_s15 }
  0x16   :  { %v21_v4 = vsel %vm18_vm0, %v19_v2, %v20_v3 }
  0x17   :  { %v25_v5 = vsub.f32 0.0, %v21_v4 }
  0x19   :  { %28 = vperm.xlu0 %52, %v25_v5  }
  0x1d   :  { %33 = vperm.xlu0 %52, %v21_v4  }
  0x98   :  { %v29_v8 = vpop.permute.xlu0 %28 }
  0x9c   :  { %v34_v9 = vpop.permute.xlu0 %33 }
  0x9d   :  { %v36_v10 = vsel %vm24_vm1, %v29_v8, %v34_v9 }
  0x9e   :  { %v37_v11 = vsub.f32 0.0, %v36_v10 }
  0xa0   :  { %v38_v12 = vmul.f32 1.442695, %v37_v11 }
  0xa2   :  { %53 = vpow2.f32 %v38_v12 }
  0xac   :  { %v54_v13 = vpop.eup %53 }
  0xad   :  { %v40_v14 = vadd.f32 1.0, %v54_v13 }
  0xaf   :  { %55 = vrcp.f32 %v40_v14 }
  0xb9   :  { %v56_v15 = vpop.eup %55 }
  0xba   :  { %v43_v16 = vsel %vm42_vm2, %v56_v15, 0.0 }
  0xbb   :  { %44 = vst [vmem:[%s99_s2] sm:$0xff] %v43_v16 }

</bundles_post_ra>
